<compile_context>
chip_gen: v7x
topology: tpu7x:2x2x1
jax: 0.10.0
libtpu: 0.0.40
codegen_flags: <defaults>
</compile_context>

<pallas_src>
import math

import jax
import jax.numpy as jnp
from jax import lax
from jax.experimental import pallas as pl
from jax.experimental.pallas import tpu as pltpu


# ----------------------------------------------------------------------------
# Fused per-graph Pallas kernel (specialized per graph architecture)
# ----------------------------------------------------------------------------
def _make_fused_gcn_kernel(n_layers, has_classifier):
    """Builds a kernel: (x, adj, W0, b0, ..., W_{L-1}, b_{L-1}) ->
    ([log_probs], gram).  All intermediates stay on-chip."""

    def kernel(*refs):
        x_ref, adj_ref = refs[0], refs[1]
        wb = refs[2:2 + 2 * n_layers]
        out_refs = refs[2 + 2 * n_layers:]

        prec = lax.Precision.DEFAULT          # pin: never multi-pass f32 emulation
        adj = adj_ref[...]                    # bf16, tiny (<= a couple of vregs)
        h = x_ref[...]                        # bf16 features; f32 after layer 1

        n_hidden = n_layers - 1 if has_classifier else n_layers
        for i in range(n_hidden):
            w = wb[2 * i][...]                # bf16
            b = wb[2 * i + 1][...]            # f32
            support = jnp.dot(h.astype(jnp.bfloat16), w,
                              preferred_element_type=jnp.float32, precision=prec)
            z = jnp.dot(adj, support.astype(jnp.bfloat16),
                        preferred_element_type=jnp.float32, precision=prec) + b
            h = jnp.maximum(z, 0.0)           # relu in f32
            # F.dropout(..., training=False) -> identity at inference.

        if has_classifier:
            w = wb[-2][...]
            b = wb[-1][...]
            support = jnp.dot(h.astype(jnp.bfloat16), w,
                              preferred_element_type=jnp.float32, precision=prec)
            logits = jnp.dot(adj, support.astype(jnp.bfloat16),
                             preferred_element_type=jnp.float32, precision=prec) + b
            # log_softmax over the (exact-width) class axis, all in f32.
            m = jnp.max(logits, axis=1, keepdims=True)
            s = logits - m
            lse = jnp.log(jnp.sum(jnp.exp(s), axis=1, keepdims=True))
            logp_ref, gram_ref = out_refs
            logp_ref[...] = (s - lse).astype(logp_ref.dtype)
        else:
            (gram_ref,) = out_refs

        # gram = feature @ feature.T, transpose folded into the MXU operand feed
        # (contract dim 1 on both operands -> no XLU relayout), f32 accumulate.
        hb = h.astype(jnp.bfloat16)
        gram = lax.dot_general(hb, hb, (((1,), (1,)), ((), ())),
                               preferred_element_type=jnp.float32, precision=prec)
        gram_ref[...] = gram.astype(gram_ref.dtype)

    return kernel


def gcn_graph_forward(x, adj, weights, biases, nclass):
    """Full GCN forward (+ optional log_softmax head, + gram matrix) for one
    graph, fused into a single Pallas kernel. Exact shapes, no padding."""
    n, _ = x.shape
    n_layers = len(weights)
    has_classifier = nclass > 1
    dims = [x.shape[1]] + [w.shape[1] for w in weights]

    # bf16 storage/MXU-feed dtype for matrices; biases stay f32 (added to the
    # f32 accumulator). In a real deployment W/adj would already live in bf16.
    operands = [x.astype(jnp.bfloat16), adj.astype(jnp.bfloat16)]
    for w, b in zip(weights, biases):
        operands.append(w.astype(jnp.bfloat16))
        operands.append(b.astype(jnp.float32))

    vmem = pltpu.MemorySpace.VMEM
    in_specs = [pl.BlockSpec(memory_space=vmem) for _ in operands]

    gram_shape = jax.ShapeDtypeStruct((n, n), jnp.float32)
    if has_classifier:
        out_shape = (jax.ShapeDtypeStruct((n, nclass), jnp.float32), gram_shape)
        out_specs = (pl.BlockSpec(memory_space=vmem),
                     pl.BlockSpec(memory_space=vmem))
    else:
        out_shape = gram_shape
        out_specs = pl.BlockSpec(memory_space=vmem)

    # Advisory cost estimate from the exact (unpadded, bf16-input) sizes.
    flops = 0
    for i in range(n_layers):
        flops += 2 * n * dims[i] * dims[i + 1]      # h @ W
        flops += 2 * n * n * dims[i + 1]            # adj @ support
    feat_dim = dims[-2] if has_classifier else dims[-1]
    flops += 2 * n * n * feat_dim                    # gram
    transcendentals = n * (nclass + 1) if has_classifier else 0
    out_elems = n * n + (n * nclass if has_classifier else 0)
    bytes_accessed = int(sum(op.size * op.dtype.itemsize for op in operands)
                         + 4 * out_elems)

    kernel = _make_fused_gcn_kernel(n_layers, has_classifier)
    fused = pl.pallas_call(
        kernel,
        out_shape=out_shape,
        in_specs=in_specs,
        out_specs=out_specs,
        cost_estimate=pl.CostEstimate(flops=flops,
                                      transcendentals=transcendentals,
                                      bytes_accessed=bytes_accessed),
    )
    # TODO(synk): when N grows (adj ~ N^2), row-tile adj with a grid + f32 VMEM
    # accumulator; size tiles against v7x's 64 MiB physical / 32 MiB default
    # scoped VMEM (not v6e's 128 MiB), use 256-aligned contracting/lane tiles
    # on v6e/v7x (128 on v5e), and raise vmem_limit_bytes with headroom.

    if has_classifier:
        logp, gram = fused(*operands)
    else:
        gram = fused(*operands)
        logp = None
    return logp, gram


# ----------------------------------------------------------------------------
# Model glue (plain JAX): parameter init + forward orchestration
# ----------------------------------------------------------------------------
def init_gcn_params(key, nfeat, nhid, nclass):
    """GraphConvolution-style uniform(-stdv, stdv) init, stdv = 1/sqrt(fan_out)."""
    dims = [nfeat] + list(nhid)
    if nclass > 1:
        dims = dims + [nclass]
    weights, biases = [], []
    for fin, fout in zip(dims[:-1], dims[1:]):
        key, kw, kb = jax.random.split(key, 3)
        stdv = 1.0 / jnp.sqrt(jnp.float32(fout))
        weights.append(jax.random.uniform(kw, (fin, fout), jnp.float32, -stdv, stdv))
        biases.append(jax.random.uniform(kb, (1, fout), jnp.float32, -stdv, stdv))
    return weights, biases


def aggccn_forward(xs, adjs, params, inputs_nclass):
    # TODO(synk): on v7x, graphs could be merged into one pallas_call with a
    # leading "parallel" grid axis (one graph per TensorCore) by padding weight
    # stacks to a common superset architecture; these graphs are heterogeneous
    # (different depths / heads), so we keep one fully-fused call per graph.
    classes_labels = []
    in_layers_output = []
    for i in range(len(xs)):
        weights, biases = params[i]
        logp, gram_out = gcn_graph_forward(xs[i], adjs[i], weights, biases,
                                           inputs_nclass[i])
        classes_labels.append(logp)
        in_layers_output.append(gram_out)
    return classes_labels, in_layers_output


# ----------------------------------------------------------------------------
# Pure-JAX f32 reference (for correctness check of the fused bf16-feed kernel)
# ----------------------------------------------------------------------------
def _reference_gcn(x, adj, weights, biases, nclass):
    n_layers = len(weights)
    end = n_layers - 1 if nclass > 1 else n_layers
    h = x
    for i in range(end):
        h = jnp.maximum(adj @ (h @ weights[i]) + biases[i], 0.0)
    logp = None
    if nclass > 1:
        logits = adj @ (h @ weights[-1]) + biases[-1]
        logp = jax.nn.log_softmax(logits, axis=1)
    return logp, h @ h.T


# ----------------------------------------------------------------------------
# Main
# ----------------------------------------------------------------------------
if __name__ == "__main__":
    key = jax.random.PRNGKey(0)

    # AggCCN config: two input graphs, one multi-class head, one feature-only.
    n_inputs = 2
    inputs_nfeat = [8, 6]
    inputs_nhid = [[16, 8], [16]]
    inputs_nclass = [3, 1]
    dropout = 0.5  # unused at inference
    n_nodes = [16, 12]

    # Deterministic params per GCN.
    params = []
    for i in range(n_inputs):
        key, sub = jax.random.split(key)
        params.append(init_gcn_params(sub, inputs_nfeat[i], inputs_nhid[i],
                                      inputs_nclass[i]))

    # Deterministic inputs.
    xs, adjs = [], []
    for i in range(n_inputs):
        key, kx, ka = jax.random.split(key, 3)
        xs.append(jax.random.normal(kx, (n_nodes[i], inputs_nfeat[i]), jnp.float32))
        a = jax.random.uniform(ka, (n_nodes[i], n_nodes[i]), jnp.float32)
        adjs.append(0.5 * (a + a.T))  # symmetric dense adjacency

    classes_labels, in_layers_output = aggccn_forward(xs, adjs, params,
                                                      inputs_nclass)

    # Block on all results.
    for cl in classes_labels:
        if cl is not None:
            jax.block_until_ready(cl)
    for g in in_layers_output:
        jax.block_until_ready(g)

    # Shape checks (exact shapes, no slicing anywhere).
    assert classes_labels[0].shape == (n_nodes[0], inputs_nclass[0])
    assert classes_labels[1] is None
    assert in_layers_output[0].shape == (n_nodes[0], n_nodes[0])
    assert in_layers_output[1].shape == (n_nodes[1], n_nodes[1])

    # Numerical check against a plain-JAX f32 reference (tolerances account for
    # the bf16 MXU operand feed; accumulation is f32).
    for i in range(n_inputs):
        w, b = params[i]
        ref_logp, ref_gram = _reference_gcn(xs[i], adjs[i], w, b,
                                            inputs_nclass[i])
        assert jnp.allclose(in_layers_output[i], ref_gram,
                            rtol=5e-2, atol=2e-1), "gram mismatch"
        if inputs_nclass[i] > 1:
            assert jnp.allclose(classes_labels[i], ref_logp,
                                rtol=5e-2, atol=2e-1), "log_softmax mismatch"

    print("KERNEL_OK")
</pallas_src>

<mosaic_0001>
module attributes {stable_mosaic.version = 11 : i64} {
  func.func @kernel(%arg0: memref<16x8xbf16, #tpu.memory_space<vmem>>, %arg1: memref<16x16xbf16, #tpu.memory_space<vmem>>, %arg2: memref<8x16xbf16, #tpu.memory_space<vmem>>, %arg3: memref<1x16xf32, #tpu.memory_space<vmem>>, %arg4: memref<16x8xbf16, #tpu.memory_space<vmem>>, %arg5: memref<1x8xf32, #tpu.memory_space<vmem>>, %arg6: memref<8x3xbf16, #tpu.memory_space<vmem>>, %arg7: memref<1x3xf32, #tpu.memory_space<vmem>>, %arg8: memref<16x3xf32, #tpu.memory_space<vmem>>, %arg9: memref<16x16xf32, #tpu.memory_space<vmem>>) attributes {dimension_semantics = [], scalar_prefetch = 0 : i64, scratch_operands = 0 : i64, tpu.core_type = #tpu.core_type<tc>} {
    %c0 = arith.constant 0 : index
    %c0_0 = arith.constant 0 : index
    %0 = vector.load %arg1[%c0, %c0_0] : memref<16x16xbf16, #tpu.memory_space<vmem>>, vector<16x16xbf16>
    %c0_1 = arith.constant 0 : index
    %c0_2 = arith.constant 0 : index
    %1 = vector.load %arg0[%c0_1, %c0_2] : memref<16x8xbf16, #tpu.memory_space<vmem>>, vector<16x8xbf16>
    %c0_3 = arith.constant 0 : index
    %c0_4 = arith.constant 0 : index
    %2 = vector.load %arg2[%c0_3, %c0_4] : memref<8x16xbf16, #tpu.memory_space<vmem>>, vector<8x16xbf16>
    %c0_5 = arith.constant 0 : index
    %c0_6 = arith.constant 0 : index
    %3 = vector.load %arg3[%c0_5, %c0_6] : memref<1x16xf32, #tpu.memory_space<vmem>>, vector<1x16xf32>
    %cst = arith.constant dense<0.000000e+00> : vector<16x16xf32>
    %4 = tpu.matmul %1, %2, %cst {dimension_numbers = #tpu.dot_dimension_numbers<[1], [0], [0], [1], [0, 0, 1, 1], [], []>} : vector<16x8xbf16>, vector<8x16xbf16>, vector<16x16xf32> -> vector<16x16xf32>
    %5 = arith.truncf %4 : vector<16x16xf32> to vector<16x16xbf16>
    %cst_7 = arith.constant dense<0.000000e+00> : vector<16x16xf32>
    %6 = tpu.matmul %0, %5, %cst_7 {dimension_numbers = #tpu.dot_dimension_numbers<[1], [0], [0], [1], [0, 0, 1, 1], [], []>} : vector<16x16xbf16>, vector<16x16xbf16>, vector<16x16xf32> -> vector<16x16xf32>
    %7 = vector.broadcast %3 : vector<1x16xf32> to vector<16x16xf32>
    %8 = arith.addf %6, %7 : vector<16x16xf32>
    %cst_8 = arith.constant 0.000000e+00 : f32
    %9 = vector.broadcast %cst_8 : f32 to vector<16x16xf32>
    %10 = arith.maximumf %8, %9 : vector<16x16xf32>
    %c0_9 = arith.constant 0 : index
    %c0_10 = arith.constant 0 : index
    %11 = vector.load %arg4[%c0_9, %c0_10] : memref<16x8xbf16, #tpu.memory_space<vmem>>, vector<16x8xbf16>
    %c0_11 = arith.constant 0 : index
    %c0_12 = arith.constant 0 : index
    %12 = vector.load %arg5[%c0_11, %c0_12] : memref<1x8xf32, #tpu.memory_space<vmem>>, vector<1x8xf32>
    %13 = arith.truncf %10 : vector<16x16xf32> to vector<16x16xbf16>
    %cst_13 = arith.constant dense<0.000000e+00> : vector<16x8xf32>
    %14 = tpu.matmul %13, %11, %cst_13 {dimension_numbers = #tpu.dot_dimension_numbers<[1], [0], [0], [1], [0, 0, 1, 1], [], []>} : vector<16x16xbf16>, vector<16x8xbf16>, vector<16x8xf32> -> vector<16x8xf32>
    %15 = arith.truncf %14 : vector<16x8xf32> to vector<16x8xbf16>
    %cst_14 = arith.constant dense<0.000000e+00> : vector<16x8xf32>
    %16 = tpu.matmul %0, %15, %cst_14 {dimension_numbers = #tpu.dot_dimension_numbers<[1], [0], [0], [1], [0, 0, 1, 1], [], []>} : vector<16x16xbf16>, vector<16x8xbf16>, vector<16x8xf32> -> vector<16x8xf32>
    %17 = vector.broadcast %12 : vector<1x8xf32> to vector<16x8xf32>
    %18 = arith.addf %16, %17 : vector<16x8xf32>
    %cst_15 = arith.constant 0.000000e+00 : f32
    %19 = vector.broadcast %cst_15 : f32 to vector<16x8xf32>
    %20 = arith.maximumf %18, %19 : vector<16x8xf32>
    %c0_16 = arith.constant 0 : index
    %c0_17 = arith.constant 0 : index
    %21 = vector.load %arg6[%c0_16, %c0_17] : memref<8x3xbf16, #tpu.memory_space<vmem>>, vector<8x3xbf16>
    %c0_18 = arith.constant 0 : index
    %c0_19 = arith.constant 0 : index
    %22 = vector.load %arg7[%c0_18, %c0_19] : memref<1x3xf32, #tpu.memory_space<vmem>>, vector<1x3xf32>
    %23 = arith.truncf %20 : vector<16x8xf32> to vector<16x8xbf16>
    %cst_20 = arith.constant dense<0.000000e+00> : vector<16x3xf32>
    %24 = tpu.matmul %23, %21, %cst_20 {dimension_numbers = #tpu.dot_dimension_numbers<[1], [0], [0], [1], [0, 0, 1, 1], [], []>} : vector<16x8xbf16>, vector<8x3xbf16>, vector<16x3xf32> -> vector<16x3xf32>
    %25 = arith.truncf %24 : vector<16x3xf32> to vector<16x3xbf16>
    %cst_21 = arith.constant dense<0.000000e+00> : vector<16x3xf32>
    %26 = tpu.matmul %0, %25, %cst_21 {dimension_numbers = #tpu.dot_dimension_numbers<[1], [0], [0], [1], [0, 0, 1, 1], [], []>} : vector<16x16xbf16>, vector<16x3xbf16>, vector<16x3xf32> -> vector<16x3xf32>
    %27 = vector.broadcast %22 : vector<1x3xf32> to vector<16x3xf32>
    %28 = arith.addf %26, %27 : vector<16x3xf32>
    %cst_22 = arith.constant dense<0xFF800000> : vector<16xf32>
    %29 = vector.multi_reduction <maximumf>, %28, %cst_22 [1] : vector<16x3xf32> to vector<16xf32>
    %30 = vector.shape_cast %29 : vector<16xf32> to vector<16x1xf32>
    %31 = vector.broadcast %30 : vector<16x1xf32> to vector<16x3xf32>
    %32 = arith.subf %28, %31 : vector<16x3xf32>
    %33 = math.exp %32 : vector<16x3xf32>
    %cst_23 = arith.constant dense<0.000000e+00> : vector<16xf32>
    %34 = vector.multi_reduction <add>, %33, %cst_23 [1] : vector<16x3xf32> to vector<16xf32>
    %35 = vector.shape_cast %34 : vector<16xf32> to vector<16x1xf32>
    %36 = math.log %35 : vector<16x1xf32>
    %37 = vector.broadcast %36 : vector<16x1xf32> to vector<16x3xf32>
    %38 = arith.subf %32, %37 : vector<16x3xf32>
    %c0_24 = arith.constant 0 : index
    %c0_25 = arith.constant 0 : index
    %39 = vector.load %arg8[%c0_24, %c0_25] : memref<16x3xf32, #tpu.memory_space<vmem>>, vector<16x3xf32>
    tpu.vector_store %arg8[%c0_24, %c0_25], %38 {strides = array<i32>} : memref<16x3xf32, #tpu.memory_space<vmem>>, vector<16x3xf32>,
    %40 = arith.truncf %20 : vector<16x8xf32> to vector<16x8xbf16>
    %cst_26 = arith.constant dense<0.000000e+00> : vector<16x16xf32>
    %41 = tpu.matmul %40, %40, %cst_26 {dimension_numbers = #tpu.dot_dimension_numbers<[1], [1], [0], [0], [0, 0, 1, 0], [], []>} : vector<16x8xbf16>, vector<16x8xbf16>, vector<16x16xf32> -> vector<16x16xf32>
    %c0_27 = arith.constant 0 : index
    %c0_28 = arith.constant 0 : index
    %42 = vector.load %arg9[%c0_27, %c0_28] : memref<16x16xf32, #tpu.memory_space<vmem>>, vector<16x16xf32>
    tpu.vector_store %arg9[%c0_27, %c0_28], %41 {strides = array<i32>} : memref<16x16xf32, #tpu.memory_space<vmem>>, vector<16x16xf32>,
    return
  }
}

</mosaic_0001>

<bundles_post_ra>
// kernel: tpu_custom_call.1
= control target key start
LH: loop header
LB: loop body
LE: loop exit
PB: predicated region body
PF: predicated region fallthrough
CT: control target
= control target key end

     0   :  { %vm48_vm0 = vcmask 1043456   ;;  %v553_v1 = vmov 0.0   ;;  %vm554_vm1 = vmmov 0   ;;  %vm44_vm2 = vcmask 64512   ;;  %s689_s0 = inlined_call_operand.vmem [shape: bf16[16,8], index: 0, kind: input, shape index: {}]   ;;  %s690_s1 = inlined_call_operand.vmem [shape: bf16[16,16], index: 1, kind: input, shape index: {}]   ;;  %s691_s2 = inlined_call_operand.vmem [shape: bf16[8,16], index: 2, kind: input, shape index: {}]   ;;  %s692_s3 = inlined_call_operand.vmem [shape: f32[1,16], index: 3, kind: input, shape index: {}]   ;;  %s693_s4 = inlined_call_operand.vmem [shape: bf16[16,8], index: 4, kind: input, shape index: {}]   ;;  %s694_s5 = inlined_call_operand.vmem [shape: f32[1,8], index: 5, kind: input, shape index: {}]   ;;  %s695_s6 = inlined_call_operand.vmem [shape: bf16[8,3], index: 6, kind: input, shape index: {}]   ;;  %s696_s7 = inlined_call_operand.vmem [shape: f32[1,3], index: 7, kind: input, shape index: {}]   ;;  %s697_s8 = inlined_call_operand.vmem [shape: f32[16,3], index: 8, kind: output, shape index: {0}]   ;;  %s698_s9 = inlined_call_operand.hbm [shape: f32[16,16], index: 9, kind: output, shape index: {1}]  }
   0x1   :  { %v37_v0 = vld [vmem:[%s691_s2] sm:$0xf]  ;;  %471 = vmatprep.subr.bf16.mxu0 %v553_v1  ;;  %477 = vmatprep.subr.bf16.mxu1 %v553_v1 }
   0x2   :  { %v50_v2 = vsel %vm48_vm0, %v37_v0, 0  ;;  %v518_v3 = vld [vmem:[%s689_s0] sm:$0xff]   ;;  %473 = vmatprep.mubr.msk.bf16.mxu0 %vm554_vm1, %v553_v1  ;;  %479 = vmatprep.mubr.msk.bf16.mxu1 %vm554_vm1, %v553_v1 }
   0x3   :  { %472 = vmatpush3.bf16.msra.mxu0 %v50_v2 }
   0x4   :  { %483 = vmatprep.subr.bf16.mxu0 %v553_v1 }
   0x5   :  { %15 = vsyncpa [#allocation3], 0  ;;  %v519_v9 = vld [vmem:[%s690_s1] sm:$0xff]   ;;  %vm105_vm3 = vcmask 130048   ;;  %vm354_vm4 = vcmask 23552  }
   0x6   :  { %474 = vmatmul.mubr.msk.bf16.vlgmr.msra.gmra.mrb[0].mxu0 %vm44_vm2, %v518_v3  ;;  %v520_v10 = vld [vmem:[%s693_s4] sm:$0xff]  }
   0x7   :  { %485 = vmatprep.mubr.msk.bf16.mxu0 %vm554_vm1, %v553_v1  ;;  %484 = vmatpush3.bf16.msra.mxu0 %v520_v10  ;;  %v446_v11 = vld [vmem:[%s692_s3] ss:$0 sm:$0xff] }
   0x8   :  { %495 = vmatprep.subr.bf16.mxu0 %v553_v1  ;;  %v256_v18 = vld [vmem:[%s695_s6] sm:$0xf] }
   0x9   :  { %v263_v21 = vsel %vm48_vm0, %v256_v18, 0  ;;  %v451_v28 = vld [vmem:[%s694_s5] ss:$0 sm:$0xff] }
   0xa   :  { %v454_v48 = vld [vmem:[%s696_s7] ss:$0 sm:$0xff]  ;;  %s555_s7 = smov [#allocation2]  }
   0xb   :  { %s431_s18 = sshll.u32 %s555_s7, 4  ;;  %s432_s18 = int_to_ptr.vmem [resolvable:$true] %s431_s18 }
   0xc   :  { %s529_s19 = scalar_lea.vmem %s432_s18, 256  ;;  %p534_p1 = scmp.lt.s32.totalorder %s432_s18, %s432_s18 }
   0xd   :  { %p530_p0 = scmp.ne.s32.totalorder %s432_s18, %s529_s19  ;;  %p535_p2 = scmp.lt.s32.totalorder %s529_s19, %s529_s19 }
   0xf   :  { %p536_p3 = por %p535_p2, %p534_p1 }
  0x11   :  { %p537_p4 = pnand %p536_p3, %p530_p0 }
  0xd9   :  { %v86_v4 = vpop.f32.mrb[0].mxu0 }
  0xda   :  { %v475_v5 = vpop.f32.mrb[1].mxu0 }
  0xdb   :  { %v89_v6 = vpop.f32.mrb[2].mxu0 }
  0xdc   :  { %v93_v7 = vpack.c.bf16 %v89_v6, %v86_v4  ;;  %v476_v8 = vpop.f32.mrb[3].mxu0 }
  0xde   :  { %478 = vmatpush3.bf16.msra.mxu1 %v93_v7 }
  0xdf   :  { %489 = vmatprep.subr.bf16.mxu1 %v553_v1 }
  0xe1   :  { %480 = vmatmul.mubr.msk.bf16.vlgmr.msra.gmra.mrb[0].mxu1 %vm105_vm3, %v519_v9 }
  0xe2   :  { %491 = vmatprep.mubr.msk.bf16.mxu1 %vm554_vm1, %v553_v1 }
 0x1b4   :  { %v143_v12 = vpop.f32.mrb[0].mxu1 }
 0x1b5   :  { %v144_v13 = vadd.f32 %v446_v11, %v143_v12  ;;  %v481_v14 = vpop.f32.mrb[1].mxu1 }
 0x1b6   :  { %v146_v15 = vpop.f32.mrb[2].mxu1 }
 0x1b7   :  { %v147_v16 = vadd.f32 %v446_v11, %v146_v15  ;;  %v482_v17 = vpop.f32.mrb[3].mxu1  ;;  %v150_v19 = vmax.f32 %v144_v13, 0.0 }
 0x1b9   :  { %v151_v20 = vmax.f32 %v147_v16, 0.0 }
 0x1bb   :  { %v155_v22 = vpack.c.bf16 %v151_v20, %v150_v19 }
 0x1bd   :  { %486 = vmatmul.mubr.msk.bf16.vlgmr.msra.gmra.mrb[4].mxu0 %vm105_vm3, %v155_v22 }
 0x1be   :  { %496 = vmatpush3.bf16.msra.mxu0 %v263_v21  ;;  %497 = vmatprep.mubr.msk.bf16.mxu0 %vm554_vm1, %v553_v1 }
 0x1bf   :  { %507 = vmatprep.subr.bf16.mxu0 %v553_v1 }
 0x290   :  { %v199_v23 = vpop.f32.mrb[4].mxu0 }
 0x291   :  { %v487_v24 = vpop.f32.mrb[5].mxu0 }
 0x292   :  { %v202_v25 = vpop.f32.mrb[6].mxu0 }
 0x293   :  { %v206_v26 = vpack.c.bf16 %v202_v25, %v199_v23  ;;  %v488_v27 = vpop.f32.mrb[7].mxu0 }
 0x295   :  { %490 = vmatpush3.bf16.msra.mxu1 %v206_v26 }
 0x296   :  { %501 = vmatprep.subr.bf16.mxu1 %v553_v1 }
 0x298   :  { %492 = vmatmul.mubr.msk.bf16.vlgmr.msra.gmra.mrb[4].mxu1 %vm105_vm3, %v519_v9 }
 0x299   :  { %503 = vmatprep.mubr.msk.bf16.mxu1 %vm554_vm1, %v553_v1 }
 0x36b   :  { %v247_v29 = vpop.f32.mrb[4].mxu1 }
 0x36c   :  { %v248_v30 = vadd.f32 %v451_v28, %v247_v29  ;;  %v493_v31 = vpop.f32.mrb[5].mxu1 }
 0x36d   :  { %v250_v32 = vpop.f32.mrb[6].mxu1 }
 0x36e   :  { %v251_v33 = vadd.f32 %v451_v28, %v250_v32  ;;  %v494_v34 = vpop.f32.mrb[7].mxu1  ;;  %v254_v35 = vmax.f32 %v248_v30, 0.0 }
 0x370   :  { %v255_v36 = vmax.f32 %v251_v33, 0.0 }
 0x372   :  { %v258_v37 = vpack.c.bf16 %v255_v36, %v254_v35 }
 0x374   :  { %498 = vmatmul.mubr.msk.bf16.vlgmr.msra.gmra.mrb[8].mxu0 %vm44_vm2, %v258_v37  ;;  %v260_v38 = vsel %vm44_vm2, %v258_v37, 0 }
 0x375   :  { %508 = vmatpush3.bf16.xpose.msra.mxu0 %v260_v38  ;;  %509 = vmatprep.mubr.msk.bf16.mxu0 %vm554_vm1, %v553_v1 }
 0x37c   :  { %510 = vmatmul.mubr.msk.bf16.vlgmr.msra.gmra.mrb[12].mxu0 %vm44_vm2, %v258_v37 }
 0x447   :  { %v299_v39 = vpop.f32.mrb[8].mxu0 }
 0x448   :  { %v499_v40 = vpop.f32.mrb[9].mxu0 }
 0x449   :  { %v302_v41 = vpop.f32.mrb[10].mxu0 }
 0x44a   :  { %v306_v42 = vpack.c.bf16 %v302_v41, %v299_v39  ;;  %v500_v43 = vpop.f32.mrb[11].mxu0 }
 0x44c   :  { %502 = vmatpush3.bf16.msra.mxu1 %v306_v42 }
 0x44f   :  { %504 = vmatmul.mubr.msk.bf16.vlgmr.msra.gmra.mrb[8].mxu1 %vm105_vm3, %v519_v9  ;;  %v415_v44 = vpop.f32.mrb[12].mxu0 }
 0x450   :  { %422 = vst.msk [vmem:[#allocation2] sm:$0xff] %vm105_vm3, %v415_v44  ;;  %v511_v45 = vpop.f32.mrb[13].mxu0 }
 0x451   :  { %v418_v46 = vpop.f32.mrb[14].mxu0 }
 0x452   :  { %423 = vst.msk [vmem:[#allocation2 + $0x8] sm:$0xff] %vm105_vm3, %v418_v46  ;;  %v512_v47 = vpop.f32.mrb[15].mxu0 }
 0x522   :  { %v347_v49 = vpop.f32.mrb[8].mxu1 }
 0x523   :  { %v348_v50 = vadd.f32 %v454_v48, %v347_v49  ;;  %v505_v51 = vpop.f32.mrb[9].mxu1 }
 0x524   :  { %v350_v52 = vpop.f32.mrb[10].mxu1 }
 0x525   :  { %v355_v53 = vsel %vm354_vm4, %v348_v50, -inf  ;;  %v351_v54 = vadd.f32 %v454_v48, %v350_v52  ;;  %v506_v55 = vpop.f32.mrb[11].mxu1 }
 0x526   :  { %356 = vmax.xlane.f32.xlu0 %v355_v53 }
 0x527   :  { %v358_v56 = vsel %vm354_vm4, %v351_v54, -inf }
 0x52a   :  { %359 = vmax.xlane.f32.xlu0 %v358_v56 }
 0x5b3   :  { %v357_v57 = vpop.xlane.xlu0 %356 }
 0x5b4   :  { %v361_v58 = vsub.f32 %v348_v50, %v357_v57 }
 0x5b6   :  { %v363_v59 = vmul.f32 1.442695, %v361_v58 }
 0x5b7   :  { %v360_v60 = vpop.xlane.xlu0 %359 }
 0x5b8   :  { %521 = vpow2.f32 %v363_v59  ;;  %v362_v61 = vsub.f32 %v351_v54, %v360_v60 }
 0x5ba   :  { %v365_v62 = vmul.f32 1.442695, %v362_v61 }
 0x5bc   :  { %523 = vpow2.f32 %v365_v62 }
 0x5c2   :  { %v522_v63 = vpop.eup %521 }
 0x5c3   :  { %v367_v0 = vsel %vm354_vm4, %v522_v63, 0.0 }
 0x5c4   :  { %368 = vadd.xlane.f32.xlu1 %v367_v0 }
 0x5c6   :  { %v524_v1 = vpop.eup %523 }
 0x5c7   :  { %v370_v2 = vsel %vm354_vm4, %v524_v1, 0.0 }
 0x5c8   :  { %371 = vadd.xlane.f32.xlu1 %v370_v2 }
 0x5c9   :  { %540 = shalt.err (!%p537_p4)
}
 0x5ca   :  { %s541_s22 = scalar_lea.hbm %s698_s9, 256 }
 0x5cb   :  { %p542_p5 = scmp.ne.s32.totalorder %s698_s9, %s541_s22  ;;  %p545_p6 = scmp.lt.u32.totalorder %s541_s22, %s698_s9 }
 0x5cd   :  { %p547_p7 = pnand %p545_p6, %p542_p5 }
 0x5cf   :  { %550 = shalt.err (!%p547_p7)
}
 0x5d0   :  { %s556_s27 = smov 128   ;;  %s557_s28 = smov 8  }
 0x5d1   :  { %437 = dma.vmem_to_hbm [thread:$0]  %s432_s18, 256, %s698_s9, [#allocation3], %s556_s27, %s556_s27, %s557_s28  }
 0x651   :  { %v369_v3 = vpop.xlane.xlu1 %368 }
 0x652   :  { %525 = vlog2.f32 %v369_v3 }
 0x655   :  { %v372_v4 = vpop.xlane.xlu1 %371 }
 0x656   :  { %527 = vlog2.f32 %v372_v4 }
 0x65c   :  { %v526_v5 = vpop.eup %525 }
 0x65d   :  { %v374_v6 = vmul.f32 0.6931472, %v526_v5 }
 0x65f   :  { %v377_v7 = vsub.f32 %v361_v58, %v374_v6 }
 0x660   :  { %v528_v8 = vpop.eup %527 }
 0x661   :  { %379 = vst.msk [vmem:[%s697_s8] sm:$0xff] %vm354_vm4, %v377_v7  ;;  %v376_v9 = vmul.f32 0.6931472, %v528_v8 }
 0x663   :  { %v378_v10 = vsub.f32 %v362_v61, %v376_v9 }
 0x665   :  { %380 = vst.msk [vmem:[%s697_s8 + $0x8] sm:$0xff] %vm354_vm4, %v378_v10 }
 0x666   :  { %551 = dma.done.wait [#allocation3], 256  }
 0x667   :  { %552 = vsyncadd [#allocation3], 4294967040 }
 0x668   :  { %443 = vsyncpa [#allocation3], 1 }

</bundles_post_ra>
